<compile_context>
chip_gen: v7x
topology: tpu7x:2x2x1
jax: 0.10.0
libtpu: 0.0.40
codegen_flags: <defaults>
</compile_context>

<pallas_src>
import math
import functools

import jax
import jax.numpy as jnp
from jax import lax
from jax.experimental import pallas as pl
from jax.experimental.pallas import tpu as pltpu


def _cross_attn_kernel(x_ref, k_ref, v_ref, mask_ref, wq_ref, bq_ref,
                       kmax_ref, kmin_ref, o_ref, *,
                       scale, cm, num_chunks, use_mask, unroll):
    # Q projection on the MXU; 1/sqrt(df) folded into Q (only TN*D multiplies).
    x = x_ref[...].astype(jnp.float32)
    q = (jnp.dot(x, wq_ref[...], preferred_element_type=jnp.float32)
         + bq_ref[...]) * scale                                    # (TN, D)

    # Exact per-(row, feature) max over the context axis via the rank-1
    # structure of the scores: max_m q*k_m = max(q*k_max, q*k_min).
    s_max = jnp.maximum(q * kmax_ref[...], q * kmin_ref[...])      # (TN, D)

    def body(i, carry):
        denom, num = carry
        off = pl.multiple_of(i * cm, cm)
        k_c = k_ref[pl.ds(off, cm), :]                             # (cm, D)
        v_c = v_ref[pl.ds(off, cm), :]                             # (cm, D)
        # Chunk of scores oriented (cm, TN, D): the axis-0 reduction is plain
        # VPU adds across vregs (no XLU sublane reductions), and only a small
        # chunk is ever live instead of the full (M, TN, D) tensor.
        p = jnp.exp(q[None, :, :] * k_c[:, None, :] - s_max[None, :, :])
        if use_mask:
            p = p * mask_ref[pl.ds(off, cm), :][:, :, None]        # zero pads
        denom = denom + jnp.sum(p, axis=0)                         # (TN, D)
        num = num + jnp.sum(p * v_c[:, None, :], axis=0)           # (TN, D)
        return denom, num

    zeros = jnp.zeros(q.shape, jnp.float32)
    denom, num = lax.fori_loop(0, num_chunks, body, (zeros, zeros),
                               unroll=unroll)

    # EUP reciprocal + one Newton step (denom >= 1 by construction).
    r = pl.reciprocal(denom, approx=True)
    r = r * (2.0 - denom * r)
    o_ref[...] = (num * r).astype(o_ref.dtype)


def _sublane_granularity(dtype):
    # Second-minor BlockSpec granularity: 8 for 4-byte, 16 for 2-byte,
    # 32 for 1-byte I/O (sublane packing).
    return max(8, 32 // jnp.dtype(dtype).itemsize)


def _vmem_limit_bytes():
    # Physical VMEM differs by generation (v5e/v6e: 128 MiB, v7x: 64 MiB).
    try:
        cap = int(pltpu.get_tpu_info().vmem_capacity_bytes)
    except Exception:
        cap = 64 * 1024 * 1024          # conservative: safe on every chip
    return min(int(cap * 0.85), 100 * 1024 * 1024)


def _pick_context_chunk(M, requested=None):
    """Rows of K/V processed per inner-loop step (multiple of 8 preferred)."""
    if requested is None:
        for cand in (32, 16, 8):
            if M % cand == 0:
                return cand, M
        requested = 8
    cm = requested
    m_pad = ((M + cm - 1) // cm) * cm
    return cm, m_pad


def _pick_tile_n(N, D, gran, cm, budget_bytes):
    """Largest query-row tile that divides N, is a multiple of `gran`, keeps
    the per-step f32 working set under `budget_bytes`, and leaves >= 2 grid
    steps when possible (v7x has 2 TensorCores on the parallel axis)."""
    per_row = (cm + 6) * D * 4        # chunk scores + q/s_max/denom/num/out
    cap = max(gran, budget_bytes // max(per_row, 1))
    cap = min(cap, 256)               # MXU-friendly upper bound
    if N >= 2 * gran:
        cap = min(cap, N // 2)        # keep the grid >= 2 steps
    cap = min(cap, N)
    best = None
    t = gran
    while t <= cap:
        if N % t == 0:
            best = t
        t += gran
    return best if best is not None else N   # odd N: single full-extent tile


def cross_attention(x, c, wq, bq, wk, bk, wv, bv, n_head, *,
                    tile_n=None, context_chunk=None):
    """Pallas implementation of CrossAttention.forward."""
    shape = x.shape
    if x.ndim == 3:
        x2 = x.reshape(-1, x.shape[-1])
        c2 = c.reshape(-1, c.shape[-1])
    else:
        x2, c2 = x, c

    N, D = x2.shape
    M = c2.shape[0]
    assert D % n_head == 0
    df = D // n_head
    scale = 1.0 / math.sqrt(df)

    f32 = jnp.float32
    hi = jax.lax.Precision.HIGHEST

    # K/V depend only on c: compute once as a single fused (D, 2D) matmul and
    # keep the results VMEM-resident in the kernel (constant index_maps).
    wkv = jnp.concatenate([wk, wv], axis=1).astype(f32)             # (D, 2D)
    bkv = jnp.concatenate([bk, bv], axis=1).astype(f32)             # (1, 2D)
    kv = jnp.dot(c2.astype(f32), wkv, precision=hi) + bkv           # (M, 2D)
    k_full = kv[:, :D]
    v_full = kv[:, D:]

    # Per-feature extremes of K (before padding): exact score max in-kernel.
    k_max = jnp.max(k_full, axis=0, keepdims=True)                  # (1, D)
    k_min = jnp.min(k_full, axis=0, keepdims=True)                  # (1, D)

    # Context chunking (+ zero-padded K/V rows masked out of the softmax sums).
    cm, m_pad = _pick_context_chunk(M, context_chunk)
    use_mask = m_pad != M
    if use_mask:
        pad = m_pad - M
        k_full = jnp.pad(k_full, ((0, pad), (0, 0)))
        v_full = jnp.pad(v_full, ((0, pad), (0, 0)))
        mask = jnp.concatenate([jnp.ones((M, 1), f32),
                                jnp.zeros((pad, 1), f32)], axis=0)
    else:
        mask = jnp.ones((m_pad, 1), f32)
    num_chunks = m_pad // cm

    vmem_limit = _vmem_limit_bytes()
    if tile_n is None:
        residents = (2 * m_pad * D + D * D + 6 * D + 2 * m_pad) * 4 * 2
        budget = max(2 * 1024 * 1024, vmem_limit // 2 - residents)
        tile_n = _pick_tile_n(N, D, _sublane_granularity(x.dtype), cm, budget)
    assert N % tile_n == 0
    grid_n = N // tile_n

    kernel = functools.partial(
        _cross_attn_kernel, scale=scale, cm=cm, num_chunks=num_chunks,
        use_mask=use_mask, unroll=(num_chunks <= 8))

    out = pl.pallas_call(
        kernel,
        out_shape=jax.ShapeDtypeStruct((N, D), x.dtype),
        grid_spec=pltpu.PrefetchScalarGridSpec(
            num_scalar_prefetch=0,
            grid=(grid_n,),
            in_specs=[
                pl.BlockSpec((tile_n, D), lambda i: (i, 0)),   # x (query tile)
                pl.BlockSpec((m_pad, D), lambda i: (0, 0)),    # K (resident)
                pl.BlockSpec((m_pad, D), lambda i: (0, 0)),    # V (resident)
                pl.BlockSpec((m_pad, 1), lambda i: (0, 0)),    # pad mask
                pl.BlockSpec((D, D), lambda i: (0, 0)),        # Wq (resident)
                pl.BlockSpec((1, D), lambda i: (0, 0)),        # bq
                pl.BlockSpec((1, D), lambda i: (0, 0)),        # k_max
                pl.BlockSpec((1, D), lambda i: (0, 0)),        # k_min
            ],
            out_specs=pl.BlockSpec((tile_n, D), lambda i: (i, 0)),
        ),
        compiler_params=pltpu.CompilerParams(
            dimension_semantics=("parallel",),
            vmem_limit_bytes=vmem_limit,
        ),
    )(x2, k_full, v_full, mask, wq.astype(f32), bq.astype(f32), k_max, k_min)

    if len(shape) == 3:
        out = out.reshape(shape)
    return out


def cross_attention_ref(x, c, wq, bq, wk, bk, wv, bv, n_head):
    """Pure-JAX reference mirroring the PyTorch forward line-by-line."""
    shape = x.shape
    x2 = x.reshape(-1, x.shape[-1]).astype(jnp.float32)
    c2 = c.reshape(-1, c.shape[-1]).astype(jnp.float32)
    D = x2.shape[-1]
    df = D // n_head
    hi = jax.lax.Precision.HIGHEST
    Q = jnp.dot(x2, wq, precision=hi) + bq
    K = jnp.dot(c2, wk, precision=hi) + bk
    V = jnp.dot(c2, wv, precision=hi) + bv
    Q = Q.reshape(Q.shape[0], n_head, df)[:, None, :, :]   # (N,1,H,df)
    K = K.reshape(K.shape[0], n_head, df)[None, :, :, :]   # (1,M,H,df)
    V = V.reshape(V.shape[0], n_head, df)[None, :, :, :]   # (1,M,H,df)
    Y = Q * K
    Y = Y / math.sqrt(Y.shape[-1])
    attn = jax.nn.softmax(Y, axis=1)
    wV = (attn * V).sum(axis=1)
    wV = wV.reshape(wV.shape[0], -1)
    if len(shape) == 3:
        wV = wV.reshape(shape)
    return wV.astype(x.dtype)


if __name__ == "__main__":
    # Small shapes consistent with the forward: x, c are (B, T, xdim).
    B, T, xdim, n_head = 2, 8, 128, 4

    key = jax.random.PRNGKey(0)
    ks = jax.random.split(key, 8)

    x = jax.random.normal(ks[0], (B, T, xdim), dtype=jnp.float32)
    c = jax.random.normal(ks[1], (B, T, xdim), dtype=jnp.float32)

    # nn.Linear-style init; weights stored transposed so the kernel computes
    # x @ W + b (i.e. W = torch_weight.T).
    def init_linear(kw, kb, d):
        bound = 1.0 / math.sqrt(d)
        w = jax.random.uniform(kw, (d, d), jnp.float32, -bound, bound)
        b = jax.random.uniform(kb, (1, d), jnp.float32, -bound, bound)
        return w, b

    wq, bq = init_linear(ks[2], ks[3], xdim)
    wk, bk = init_linear(ks[4], ks[5], xdim)
    wv, bv = init_linear(ks[6], ks[7], xdim)

    out = cross_attention(x, c, wq, bq, wk, bk, wv, bv, n_head)
    out = jax.block_until_ready(out)

    expected = cross_attention_ref(x, c, wq, bq, wk, bk, wv, bv, n_head)
    assert out.shape == expected.shape == (B, T, xdim)
    # 2e-3 tolerance covers MXU f32-pass differences vs. the XLA reference and
    # the Newton-refined approximate reciprocal in the softmax normalization.
    assert jnp.allclose(out, expected, atol=2e-3, rtol=2e-3), (
        float(jnp.max(jnp.abs(out - expected))))

    print("KERNEL_OK")
</pallas_src>

<mosaic_0001>
module attributes {stable_mosaic.version = 11 : i64} {
  func.func @_cross_attn_kernel(%arg0: i32, %arg1: memref<8x128xf32, #tpu.memory_space<vmem>>, %arg2: memref<16x128xf32, #tpu.memory_space<vmem>>, %arg3: memref<16x128xf32, #tpu.memory_space<vmem>>, %arg4: memref<16x1xf32, #tpu.memory_space<vmem>>, %arg5: memref<128x128xf32, #tpu.memory_space<vmem>>, %arg6: memref<1x128xf32, #tpu.memory_space<vmem>>, %arg7: memref<1x128xf32, #tpu.memory_space<vmem>>, %arg8: memref<1x128xf32, #tpu.memory_space<vmem>>, %arg9: memref<8x128xf32, #tpu.memory_space<vmem>>) attributes {dimension_semantics = [#tpu.dimension_semantics<parallel>], iteration_bounds = array<i64: 2>, scalar_prefetch = 0 : i64, scratch_operands = 0 : i64, tpu.core_type = #tpu.core_type<tc>, window_params = [{transform_indices = @transform_0, window_bounds = array<i64: 8, 128>}, {pipeline_mode = #tpu.pipeline_mode<synchronous>, transform_indices = @transform_1, window_bounds = array<i64: 16, 128>}, {pipeline_mode = #tpu.pipeline_mode<synchronous>, transform_indices = @transform_2, window_bounds = array<i64: 16, 128>}, {pipeline_mode = #tpu.pipeline_mode<synchronous>, transform_indices = @transform_3, window_bounds = array<i64: 16, 1>}, {pipeline_mode = #tpu.pipeline_mode<synchronous>, transform_indices = @transform_4, window_bounds = array<i64: 128, 128>}, {pipeline_mode = #tpu.pipeline_mode<synchronous>, transform_indices = @transform_5, window_bounds = array<i64: 1, 128>}, {pipeline_mode = #tpu.pipeline_mode<synchronous>, transform_indices = @transform_6, window_bounds = array<i64: 1, 128>}, {pipeline_mode = #tpu.pipeline_mode<synchronous>, transform_indices = @transform_7, window_bounds = array<i64: 1, 128>}, {transform_indices = @transform_8, window_bounds = array<i64: 8, 128>}]} {
    %c0 = arith.constant 0 : index
    %c0_0 = arith.constant 0 : index
    %0 = vector.load %arg1[%c0, %c0_0] : memref<8x128xf32, #tpu.memory_space<vmem>>, vector<8x128xf32>
    %c0_1 = arith.constant 0 : index
    %c0_2 = arith.constant 0 : index
    %1 = vector.load %arg5[%c0_1, %c0_2] : memref<128x128xf32, #tpu.memory_space<vmem>>, vector<128x128xf32>
    %cst = arith.constant dense<0.000000e+00> : vector<8x128xf32>
    %2 = tpu.matmul %0, %1, %cst {dimension_numbers = #tpu.dot_dimension_numbers<[1], [0], [0], [1], [0, 0, 1, 1], [], []>} : vector<8x128xf32>, vector<128x128xf32>, vector<8x128xf32> -> vector<8x128xf32>
    %c0_3 = arith.constant 0 : index
    %c0_4 = arith.constant 0 : index
    %3 = vector.load %arg6[%c0_3, %c0_4] : memref<1x128xf32, #tpu.memory_space<vmem>>, vector<1x128xf32>
    %4 = vector.broadcast %3 : vector<1x128xf32> to vector<8x128xf32>
    %5 = arith.addf %2, %4 : vector<8x128xf32>
    %cst_5 = arith.constant 0.176776692 : f32
    %6 = vector.broadcast %cst_5 : f32 to vector<8x128xf32>
    %7 = arith.mulf %5, %6 : vector<8x128xf32>
    %c0_6 = arith.constant 0 : index
    %c0_7 = arith.constant 0 : index
    %8 = vector.load %arg7[%c0_6, %c0_7] : memref<1x128xf32, #tpu.memory_space<vmem>>, vector<1x128xf32>
    %9 = vector.broadcast %8 : vector<1x128xf32> to vector<8x128xf32>
    %10 = arith.mulf %7, %9 : vector<8x128xf32>
    %c0_8 = arith.constant 0 : index
    %c0_9 = arith.constant 0 : index
    %11 = vector.load %arg8[%c0_8, %c0_9] : memref<1x128xf32, #tpu.memory_space<vmem>>, vector<1x128xf32>
    %12 = vector.broadcast %11 : vector<1x128xf32> to vector<8x128xf32>
    %13 = arith.mulf %7, %12 : vector<8x128xf32>
    %14 = arith.maximumf %10, %13 : vector<8x128xf32>
    %cst_10 = arith.constant 0.000000e+00 : f32
    %15 = vector.broadcast %cst_10 : f32 to vector<8x128xf32>
    %c0_i32 = arith.constant 0 : i32
    %c16_i32 = arith.constant 16 : i32
    %16 = arith.muli %c0_i32, %c16_i32 : i32
    %17 = tpu.assume_multiple %16, 16 : i32
    %18 = arith.index_cast %17 : i32 to index
    %c0_11 = arith.constant 0 : index
    %19 = vector.load %arg2[%18, %c0_11] : memref<16x128xf32, #tpu.memory_space<vmem>>, vector<16x128xf32>
    %20 = arith.index_cast %17 : i32 to index
    %c0_12 = arith.constant 0 : index
    %21 = vector.load %arg3[%20, %c0_12] : memref<16x128xf32, #tpu.memory_space<vmem>>, vector<16x128xf32>
    %22 = vector.shape_cast %7 : vector<8x128xf32> to vector<1x8x128xf32>
    %23 = vector.shape_cast %19 : vector<16x128xf32> to vector<16x1x128xf32>
    %24 = vector.broadcast %22 : vector<1x8x128xf32> to vector<16x8x128xf32>
    %25 = vector.broadcast %23 : vector<16x1x128xf32> to vector<16x8x128xf32>
    %26 = arith.mulf %24, %25 : vector<16x8x128xf32>
    %27 = vector.shape_cast %14 : vector<8x128xf32> to vector<1x8x128xf32>
    %28 = vector.broadcast %27 : vector<1x8x128xf32> to vector<16x8x128xf32>
    %29 = arith.subf %26, %28 : vector<16x8x128xf32>
    %30 = math.exp %29 : vector<16x8x128xf32>
    %cst_13 = arith.constant dense<0.000000e+00> : vector<8x128xf32>
    %31 = vector.multi_reduction <add>, %30, %cst_13 [0] : vector<16x8x128xf32> to vector<8x128xf32>
    %32 = arith.addf %15, %31 : vector<8x128xf32>
    %33 = vector.shape_cast %21 : vector<16x128xf32> to vector<16x1x128xf32>
    %34 = vector.broadcast %33 : vector<16x1x128xf32> to vector<16x8x128xf32>
    %35 = arith.mulf %30, %34 : vector<16x8x128xf32>
    %cst_14 = arith.constant dense<0.000000e+00> : vector<8x128xf32>
    %36 = vector.multi_reduction <add>, %35, %cst_14 [0] : vector<16x8x128xf32> to vector<8x128xf32>
    %37 = arith.addf %15, %36 : vector<8x128xf32>
    %c1_i32 = arith.constant 1 : i32
    %38 = tpu.reciprocal %32 {approx = true} : vector<8x128xf32> -> vector<8x128xf32>
    %39 = arith.mulf %32, %38 : vector<8x128xf32>
    %cst_15 = arith.constant 2.000000e+00 : f32
    %40 = vector.broadcast %cst_15 : f32 to vector<8x128xf32>
    %41 = arith.subf %40, %39 : vector<8x128xf32>
    %42 = arith.mulf %38, %41 : vector<8x128xf32>
    %43 = arith.mulf %37, %42 : vector<8x128xf32>
    %c0_16 = arith.constant 0 : index
    %c0_17 = arith.constant 0 : index
    %44 = vector.load %arg9[%c0_16, %c0_17] : memref<8x128xf32, #tpu.memory_space<vmem>>, vector<8x128xf32>
    tpu.vector_store %arg9[%c0_16, %c0_17], %43 {strides = array<i32>} : memref<8x128xf32, #tpu.memory_space<vmem>>, vector<8x128xf32>,
    return
  }
  func.func @transform_0(%arg0: i32) -> (i32, i32) {
    %c0_i32 = arith.constant 0 : i32
    %c0_i32_0 = arith.constant 0 : i32
    return %arg0, %c0_i32 : i32, i32
  }
  func.func @transform_1(%arg0: i32) -> (i32, i32) {
    %c0_i32 = arith.constant 0 : i32
    %c0_i32_0 = arith.constant 0 : i32
    %c0_i32_1 = arith.constant 0 : i32
    return %c0_i32, %c0_i32_0 : i32, i32
  }
  func.func @transform_2(%arg0: i32) -> (i32, i32) {
    %c0_i32 = arith.constant 0 : i32
    %c0_i32_0 = arith.constant 0 : i32
    %c0_i32_1 = arith.constant 0 : i32
    return %c0_i32, %c0_i32_0 : i32, i32
  }
  func.func @transform_3(%arg0: i32) -> (i32, i32) {
    %c0_i32 = arith.constant 0 : i32
    %c0_i32_0 = arith.constant 0 : i32
    %c0_i32_1 = arith.constant 0 : i32
    return %c0_i32, %c0_i32_0 : i32, i32
  }
  func.func @transform_4(%arg0: i32) -> (i32, i32) {
    %c0_i32 = arith.constant 0 : i32
    %c0_i32_0 = arith.constant 0 : i32
    %c0_i32_1 = arith.constant 0 : i32
    return %c0_i32, %c0_i32_0 : i32, i32
  }
  func.func @transform_5(%arg0: i32) -> (i32, i32) {
    %c0_i32 = arith.constant 0 : i32
    %c0_i32_0 = arith.constant 0 : i32
    %c0_i32_1 = arith.constant 0 : i32
    return %c0_i32, %c0_i32_0 : i32, i32
  }
  func.func @transform_6(%arg0: i32) -> (i32, i32) {
    %c0_i32 = arith.constant 0 : i32
    %c0_i32_0 = arith.constant 0 : i32
    %c0_i32_1 = arith.constant 0 : i32
    return %c0_i32, %c0_i32_0 : i32, i32
  }
  func.func @transform_7(%arg0: i32) -> (i32, i32) {
    %c0_i32 = arith.constant 0 : i32
    %c0_i32_0 = arith.constant 0 : i32
    %c0_i32_1 = arith.constant 0 : i32
    return %c0_i32, %c0_i32_0 : i32, i32
  }
  func.func @transform_8(%arg0: i32) -> (i32, i32) {
    %c0_i32 = arith.constant 0 : i32
    %c0_i32_0 = arith.constant 0 : i32
    return %arg0, %c0_i32 : i32, i32
  }
}

</mosaic_0001>

<bundles_post_ra>
// kernel: tpu_custom_call.1
= control target key start
LH: loop header
LB: loop body
LE: loop exit
PB: predicated region body
PF: predicated region fallthrough
CT: control target
= control target key end

     0   :  { %13 = vsyncpa [#allocation3], 0  ;;  %s1802_s0 = inlined_call_operand.vmem [shape: f32[16,128], index: 0, kind: input, shape index: {}]   ;;  %s1803_s1 = inlined_call_operand.hbm [shape: f32[16,128], index: 1, kind: input, shape index: {}]   ;;  %s1804_s2 = inlined_call_operand.hbm [shape: f32[16,128], index: 2, kind: input, shape index: {}]   ;;  %s1805_s3 = inlined_call_operand.vmem [shape: f32[16,1], index: 3, kind: input, shape index: {}]   ;;  %s1806_s4 = inlined_call_operand.hbm [shape: f32[128,128], index: 4, kind: input, shape index: {}]   ;;  %s1807_s5 = inlined_call_operand.vmem [shape: f32[1,128], index: 5, kind: input, shape index: {}]   ;;  %s1808_s6 = inlined_call_operand.vmem [shape: f32[1,128], index: 6, kind: input, shape index: {}]   ;;  %s1809_s7 = inlined_call_operand.vmem [shape: f32[1,128], index: 7, kind: input, shape index: {}]   ;;  %s1810_s8 = inlined_call_operand.hbm [shape: f32[16,128], index: 8, kind: output, shape index: {}]  }
   0x1   :  { %14 = vsyncpa [#allocation6], 0 }
   0x2   :  { %15 = vsyncpa [#allocation4], 0 }
   0x3   :  { %17 = vsyncpa [#allocation4 + $0x1], 0  ;;  %s1463_s3 = smov 0   ;;  %s1465_s27 = smov 0  }
   0x4   :  { %s1467_s28 = smov 0   ;;  %s1469_s29 = smov 0  }
   0x5 LB: > { %1817 = sst [smem:[#allocation12_spill]] %s1402_s28  ;;  %s1484_s30 = sadd.s32 4294967295, %s1406_s29   ;;  %s1406_s29 = sphi %s1469_s29, %s1832_s29   ;;  %s1402_s28 = sphi %s1467_s28, %s1834_s28   ;;  %s1398_s27 = sphi %s1465_s27, %s1836_s27   ;;  %s1394_s3 = sphi %s1463_s3, %s1835_s3  }
   0x6   : > { %s1043_s9 = sadd.s32 4294967294, %s1406_s29   ;;  %s1488_s10 = sadd.s32 1, %s1406_s29  }
   0x7   : > { %1818 = sst [smem:[#allocation13_spill]] %s1488_s10  ;;  %s203_s11 = sadd.s32 1, %s1402_s28 }
   0x8   : > { %s200_s12 = ssub.s32 %s1406_s29, %s1488_s10  ;;  %p213_p0 = scmp.ne.s32.totalorder %s1402_s28, %s1398_s27 }
   0x9   : > { %p201_p1 = scmp.eq.s32.totalorder %s200_s12, 0  ;;  %p214_p2 = scmp.eq.s32.totalorder %s1484_s30, 1 }
   0xa   : > { %p219_p3 = scmp.ne.s32.totalorder %s1398_s27, %s1394_s3  ;;  %p220_p4 = scmp.eq.s32.totalorder %s1043_s9, 1 }
   0xb   : > { %s1499_s13 = scalar_select %p201_p1, %s1402_s28, %s203_s11  }
   0xc   : > { %p1501_p5 = por %p214_p2, %p213_p0  ;;  %p1505_p6 = por %p220_p4, %p219_p3 }
   0xd   : > { %1819 = sst [smem:[#allocation14_spill]] %s1499_s13  ;;  %p1044_p7 = scmp.ge.s32.totalorder %s1406_s29, 1 }
   0xe   : > { %s1820_s14 = scalar_select %p1501_p5, 1, 0 }
   0xf   : > { %s1821_s15 = scalar_select %p1505_p6, 1, 0 }
  0x10   : > { %p227_p8 = scmp.lt.s32.totalorder %s1406_s29, 3  ;;  %p1811_p9 = scmp.eq.s32.totalorder %s1484_s30, 0 }
  0x11   : > { %s1408_s17 = smov [#allocation5]   ;;  %s1409_s20 = smov [#allocation2]  }
  0x12   : > { %p1512_p10 = pnand %p1044_p7, %p227_p8  ;;  %s252_s18 = sshll.u32 %s1408_s17, 4  ;;  %s1518_s18 = int_to_ptr.vmem [resolvable:$true] %s252_s18 }
  0x13   : > { %s239_s21 = sshll.u32 %s1409_s20, 4  ;;  %s1410_s22 = smov [#allocation7]   ;;  %s1526_s21 = int_to_ptr.vmem [resolvable:$true] %s239_s21 }
  0x14   : > { %s1822_s16 = scalar_select %p1512_p10, 1, 0 }
  0x15   : > { %p1152_p11 = pneg %p1512_p10  ;;  %s1528_s23 = sshll.u32 %s1410_s22, 4  ;;  %s269_s23 = int_to_ptr.vmem [resolvable:$true] %s1528_s23 }
  0x16   : > { %s1252_s26 = scalar_lea.hbm %s1804_s2, 256 }
  0x17   : > { %p1522_p12 = pnand %p1811_p9, %p1152_p11  ;;  %p1253_p13 = scmp.ne.s32.totalorder %s1804_s2, %s1252_s26 }
  0x18   : > { %p1259_p3 = scmp.lt.u32.totalorder %s1252_s26, %s1804_s2 }
  0x19   : > { %p1538_p0 = pneg %p1522_p12 }
  0x1b   : > { %p1255_p1 = pnand %p1538_p0, %p1253_p13 }
  0x1d   : > { %p1256_p2 = pneg %p1255_p1 }
  0x1f   : > { %p1261_p4 = pnand %p1259_p3, %p1256_p2 }
  0x21   : > { %1264 = shalt.err (!%p1261_p4)
}
  0x22   : > { %s1265_s22 = scalar_lea.vmem %s1518_s18, 256  ;;  %p1273_p9 = scmp.lt.s32.totalorder %s1518_s18, %s1518_s18 }
  0x23   : > { %p1266_p7 = scmp.ne.s32.totalorder %s1518_s18, %s1265_s22  ;;  %p1274_p6 = scmp.lt.s32.totalorder %s1265_s22, %s1265_s22 }
  0x25   : > { %p1268_p8 = pnand %p1266_p7, %p1538_p0  ;;  %p1275_p13 = por %p1274_p6, %p1273_p9 }
  0x27   : > { %p1269_p11 = pneg %p1268_p8 }
  0x29   : > { %p1276_p1 = pnand %p1275_p13, %p1269_p11 }
  0x2b   : > { %1279 = shalt.err (!%p1276_p1)
}
  0x2c   : > { %s1411_s24 = smov 128   ;;  %s1412_s25 = smov 8  }
  0x2d   : > { %1158 = dma.hbm_to_vmem [thread:$0]  (!%p1522_p12), %s1804_s2, 256, %s1518_s18, [#allocation6], %s1411_s24, %s1411_s24, %s1412_s25  }
  0x2e   : > { %s1280_s20 = scalar_lea.hbm %s1803_s1, 256 }
  0x2f   : > { %p1281_p6 = scmp.ne.s32.totalorder %s1803_s1, %s1280_s20  ;;  %p1287_p3 = scmp.lt.u32.totalorder %s1280_s20, %s1803_s1 }
  0x31   : > { %p1283_p9 = pnand %p1281_p6, %p1538_p0 }
  0x33   : > { %p1284_p2 = pneg %p1283_p9 }
  0x35   : > { %p1289_p4 = pnand %p1287_p3, %p1284_p2 }
  0x37   : > { %1292 = shalt.err (!%p1289_p4)
}
  0x38   : > { %s1293_s18 = scalar_lea.vmem %s1526_s21, 256  ;;  %p1301_p13 = scmp.lt.s32.totalorder %s1526_s21, %s1526_s21 }
  0x39   : > { %p1294_p7 = scmp.ne.s32.totalorder %s1526_s21, %s1293_s18  ;;  %p1302_p1 = scmp.lt.s32.totalorder %s1293_s18, %s1293_s18 }
  0x3b   : > { %p1296_p8 = pnand %p1294_p7, %p1538_p0  ;;  %p1303_p6 = por %p1302_p1, %p1301_p13 }
  0x3d   : > { %p1297_p11 = pneg %p1296_p8 }
  0x3f   : > { %p1304_p9 = pnand %p1303_p6, %p1297_p11 }
  0x41   : > { %1307 = shalt.err (!%p1304_p9)
}
  0x42   : > { %1155 = dma.hbm_to_vmem [thread:$0]  (!%p1522_p12), %s1803_s1, 256, %s1526_s21, [#allocation3], %s1411_s24, %s1411_s24, %s1412_s25  }
  0x43   : > { %s1308_s9 = scalar_lea.hbm %s1806_s4, 2048 }
  0x44   : > { %p1309_p2 = scmp.ne.s32.totalorder %s1806_s4, %s1308_s9  ;;  %p1315_p7 = scmp.lt.u32.totalorder %s1308_s9, %s1806_s4 }
  0x46   : > { %p1311_p3 = pnand %p1309_p2, %p1538_p0 }
  0x48   : > { %p1312_p4 = pneg %p1311_p3 }
  0x4a   : > { %p1317_p8 = pnand %p1315_p7, %p1312_p4 }
  0x4c   : > { %1320 = shalt.err (!%p1317_p8)
}
  0x4d   : > { %s1321_s18 = scalar_lea.vmem %s269_s23, 2048  ;;  %p1329_p6 = scmp.lt.s32.totalorder %s269_s23, %s269_s23 }
  0x4e   : > { %p1322_p11 = scmp.ne.s32.totalorder %s269_s23, %s1321_s18  ;;  %p1330_p9 = scmp.lt.s32.totalorder %s1321_s18, %s1321_s18 }
  0x50   : > { %p1324_p13 = pnand %p1322_p11, %p1538_p0  ;;  %p1331_p5 = por %p1330_p9, %p1329_p6 }
  0x52   : > { %p1325_p1 = pneg %p1324_p13 }
  0x54   : > { %p1332_p10 = pnand %p1331_p5, %p1325_p1 }
  0x56   : > { %1335 = shalt.err (!%p1332_p10)
}
  0x57   : > { %1161 = dma.hbm_to_vmem [thread:$0]  (!%p1522_p12), %s1806_s4, 2048, %s269_s23, [#allocation6], %s1411_s24, %s1411_s24, %s1412_s25  }
  0x58   : > { %p1825_p2 = scmp.ne.s32.totalorder %s1822_s16, 0 }
  0x59   : > { %p1826_p0 = scmp.eq.s32.totalorder (!%p1825_p2), %s1484_s30, 0 }
  0x5a   : > { %300 = sbr.rel (%p1825_p2) target bundleno = 434 (0x1b2), region = 52 }
  0x61   : > { %1381 = dma.done.wait (%p1826_p0), [#allocation3], 256   ;;  %p1827_p3 = pmov %p1826_p0 }
  0x62   : > { %p1828_p5 = pmov %p1826_p0 }
  0x63   : > { %1383 = vsyncadd (%p1827_p3), [#allocation3], 4294967040 }
  0x64   : > { %1385 = dma.done.wait (%p1828_p5), [#allocation6], 2304   ;;  %p1829_p10 = pmov %p1826_p0 }
  0x65   : > { %v1413_v0 = vmov 0.0|0.0   ;;  %vm1414_vm0 = vmmov 0   ;;  %v1415_v1 = vmov 0.0   ;;  %v346_v2 = vld [vmem:[#allocation7] sm:$0xff]  ;;  %v347_v3 = vld [vmem:[#allocation7 + $0x8] sm:$0xff]  ;;  %v348_v4 = vld [vmem:[#allocation7 + $0x10] sm:$0xff]  ;;  %v467_v29 = vlaneseq }
  0x66   : > { %1387 = vsyncadd (%p1829_p10), [#allocation6], 4294964992  ;;  %1114 = vmatprep.subr.bf16.mxu0 %v1413_v0  ;;  %1111 = vmatprep.mubr.msk.f32.mxu0 %vm1414_vm0, %v1415_v1  ;;  %v1115_v5 = vpack.c.bf16 %v347_v3, %v346_v2  ;;  %v349_v6 = vld [vmem:[#allocation7 + $0x18] sm:$0xff]  ;;  %v350_v8 = vld [vmem:[#allocation7 + $0x20] sm:$0xff]  ;;  %p341_p12 = scmp.lt.s32.totalorder %s1484_s30, 1  ;;  %s338_s17 = sand.u32 1, %s1398_s27  }
  0x67   : > { %v1118_v7 = vpack.c.bf16 %v349_v6, %v348_v4  ;;  %v351_v9 = vld [vmem:[#allocation7 + $0x28] sm:$0xff]  ;;  %v352_v11 = vld [vmem:[#allocation7 + $0x30] sm:$0xff]  ;;  %v353_v12 = vld [vmem:[#allocation7 + $0x38] sm:$0xff]  ;;  %v1416_v27 = vmov 1966171168   ;;  %v468_v31 = vshrl.u32 %v467_v29, 7 }
  0x68   : > { %1116 = vmatpush3.bf16.msra.mxu0 %v1115_v5  ;;  %v1121_v10 = vpack.c.bf16 %v351_v9, %v350_v8  ;;  %v1124_v13 = vpack.c.bf16 %v353_v12, %v352_v11  ;;  %v354_v14 = vld [vmem:[#allocation7 + $0x40] sm:$0xff]  ;;  %v355_v15 = vld [vmem:[#allocation7 + $0x48] sm:$0xff]  ;;  %v356_v17 = vld [vmem:[#allocation7 + $0x50] sm:$0xff]  ;;  %s342_s16 = scalar_select %p341_p12, %s1484_s30, 1  ;;  %v465_v28 = vunpack.c.l.s4 %v1416_v27 }
  0x69   : > { %1117 = vmatprep.subr.bf16.mxu0 %v1413_v0  ;;  %v1127_v16 = vpack.c.bf16 %v355_v15, %v354_v14  ;;  %v357_v18 = vld [vmem:[#allocation7 + $0x58] sm:$0xff]  ;;  %v358_v20 = vld [vmem:[#allocation7 + $0x60] sm:$0xff]  ;;  %v359_v21 = vld [vmem:[#allocation7 + $0x68] sm:$0xff]  ;;  %v1634_v44 = vsub.s32 0, %v468_v31  ;;  %s1053_s20 = sshll.u32 %s338_s17, 3  ;;  %s1059_s22 = sshll.u32 %s1484_s30, 7 }
  0x6a   : > { %v1130_v19 = vpack.c.bf16 %v357_v18, %v356_v17  ;;  %v1133_v22 = vpack.c.bf16 %v359_v21, %v358_v20  ;;  %v360_v23 = vld [vmem:[#allocation7 + $0x70] sm:$0xff]  ;;  %v361_v24 = vld [vmem:[#allocation7 + $0x78] sm:$0xff]  ;;  %s1054_s19 = sshll.u32 %s342_s16, 3  ;;  %v466_v30 = vunpack.c.0.s8 %v465_v28  ;;  %v457_v33 = vld [vmem:[#allocation2] sm:$0xff]  ;;  %s340_s18 = scalar_lea.vmem [#allocation8], %s1053_s20 }
  0x6b   : > { %v1136_v25 = vpack.c.bf16 %v361_v24, %v360_v23  ;;  %s344_s24 = scalar_lea.vmem %s1802_s0, %s1054_s19  ;;  %v463_v35 = vcombine.high %v457_v33, %v457_v33  ;;  %v458_v37 = vld [vmem:[#allocation2 + $0x8] sm:$0xff]  ;;  %v1055_v41 = vld [vmem:[%s1807_s5] ss:$0 sm:$0xff]  ;;  %v459_v14 = vld [vmem:[#allocation5] sm:$0xff]  ;;  %s953_s21 = sshll.u32 %s340_s18, 4  ;;  %s1762_s21 = int_to_ptr.vmem [resolvable:$true] %s953_s21 }
  0x6c   : > { %1119 = vmatpush3.bf16.msra.mxu0 %v1118_v7  ;;  %v345_v26 = vld [vmem:[%s344_s24] sm:$0xff]  ;;  %v1625_v32 = vsub.s32 %v466_v30, %v468_v31  ;;  %v512_v42 = vcombine.high %v458_v37, %v458_v37  ;;  %v723_v29 = vcombine.high %v459_v14, %v459_v14  ;;  %s1760_s19 = scalar_lea.hbm %s1810_s8, %s1059_s22  ;;  %s940_s23 = scalar_lea.sflag [#allocation4], %s338_s17 }
  0x6d   : > { %1120 = vmatprep.subr.bf16.mxu0 %v1413_v0  ;;  %v1056_v51 = vld [vmem:[%s1808_s6] ss:$0 sm:$0xff]  ;;  %s1336_s12 = scalar_lea.vmem %s1762_s21, 128  ;;  %p1830_p7 = scmp.ne.s32.totalorder %s1820_s14, 0 }
  0x6e   : > { %v470_v34 = vrot.slane %v457_v33, %v1625_v32  ;;  %v477_v38 = vrot.slane %v463_v35, %v1625_v32  ;;  %v1057_v52 = vld [vmem:[%s1809_s7] ss:$0 sm:$0xff]  ;;  %v519_v53 = vrot.slane %v458_v37, %v1625_v32  ;;  %v526_v54 = vrot.slane %v512_v42, %v1625_v32  ;;  %p1337_p4 = scmp.ne.s32.totalorder %s1762_s21, %s1336_s12  ;;  %s1417_s30 = smov [#allocation8]  }
  0x6f   : > { %v730_v21 = vrot.slane %v459_v14, %v1625_v32  ;;  %v737_v42 = vrot.slane %v723_v29, %v1625_v32  ;;  %s1340_s24 = sshll.u32 %s1417_s30, 4  ;;  %s1341_s24 = int_to_ptr.vmem [resolvable:$false] %s1340_s24 }
  0x70   : > { %1122 = vmatpush3.bf16.msra.mxu0 %v1121_v10  ;;  %v478_v36 = vcombine.high %v470_v34, %v470_v34  ;;  %v486_v39 = vrot.slane %v470_v34, %v1625_v32  ;;  %v479_v43 = vcombine.high %v477_v38, %v477_v38  ;;  %v493_v50 = vrot.slane %v477_v38, %v1625_v32  ;;  %p1338_p8 = pnand %p1337_p4, %p1830_p7  ;;  %s1342_s25 = scalar_lea.vmem %s1341_s24, 256 }
  0x71   : > { %1123 = vmatprep.subr.bf16.mxu0 %v1413_v0  ;;  %v528_v1 = vcombine.high %v526_v54, %v526_v54  ;;  %v535_v5 = vrot.slane %v519_v53, %v1625_v32  ;;  %v1664_v11 = vrot.slane %v526_v54, %v1625_v32  ;;  %v738_v37 = vcombine.high %v730_v21, %v730_v21  ;;  %p1343_p13 = scmp.lt.s32.totalorder %s1762_s21, %s1341_s24  ;;  %p1344_p1 = scmp.lt.s32.totalorder %s1342_s25, %s1336_s12 }
  0x72   : > { %v500_v40 = vrot.slane %v478_v36, %v1625_v32  ;;  %v508_v46 = vcombine.high %v486_v39, %v486_v39  ;;  %v507_v56 = vrot.slane %v479_v43, %v1625_v32  ;;  %v564_v57 = vrot.slane %v486_v39, %v1634_v44  ;;  %p1339_p11 = pneg %p1338_p8 }
  0x73   : > { %v509_v63 = vcombine.high %v493_v50, %v493_v50  ;;  %v580_v2 = vrot.slane %v493_v50, %v1634_v44  ;;  %v1674_v20 = vrot.slane %v528_v1, %v1625_v32  ;;  %v596_v36 = vrot.slane %v535_v5, %v1634_v44  ;;  %p1345_p6 = por %p1344_p1, %p1343_p13 }
  0x74   : > { %1125 = vmatpush3.bf16.msra.mxu0 %v1124_v13  ;;  %v510_v47 = vcombine.high %v500_v40, %v500_v40  ;;  %v568_v58 = vrot.slane %v500_v40, %v1634_v44  ;;  %v572_v59 = vrot.slane %v508_v46, %v1634_v44  ;;  %v511_v4 = vcombine.high %v507_v56, %v507_v56 }
  0x75   : > { %1126 = vmatprep.subr.bf16.mxu0 %v1413_v0  ;;  %v584_v7 = vrot.slane %v507_v56, %v1634_v44  ;;  %v588_v12 = vrot.slane %v509_v63, %v1634_v44  ;;  %v746_v43 = vrot.slane %v730_v21, %v1625_v32  ;;  %v616_v54 = vrot.slane %v1674_v20, %v1634_v44  ;;  %p1346_p9 = pnand %p1345_p6, %p1339_p11 }
  0x76   : > { %v576_v60 = vrot.slane %v510_v47, %v1634_v44  ;;  %v592_v23 = vrot.slane %v511_v4, %v1634_v44  ;;  %v753_v1 = vrot.slane %v737_v42, %v1625_v32 }
  0x77   : > { %v824_v63 = vrot.slane %v746_v43, %v1634_v44 }
  0x78   : > { %1128 = vmatpush3.bf16.msra.mxu0 %v1127_v16 }
  0x79   : > { %1129 = vmatprep.subr.bf16.mxu0 %v1413_v0 }
  0x7c   : > { %1131 = vmatpush3.bf16.msra.mxu0 %v1130_v19 }
  0x7d   : > { %1132 = vmatprep.subr.bf16.mxu0 %v1413_v0 }
  0x80   : > { %1134 = vmatpush3.bf16.msra.mxu0 %v1133_v22  ;;  %v557_v22 = vcombine.high %v535_v5, %v535_v5 }
  0x81   : > { %1135 = vmatprep.subr.bf16.mxu0 %v1413_v0  ;;  %v527_v0 = vcombine.high %v519_v53, %v519_v53  ;;  %v612_v53 = vrot.slane %v1664_v11, %v1634_v44 }
  0x83   : > { %v549_v19 = vrot.slane %v527_v0, %v1625_v32 }
  0x84   : > { %1137 = vmatpush3.bf16.msra.mxu0 %v1136_v25 }
  0x85   : > { %v559_v35 = vcombine.high %v549_v19, %v549_v19 }
  0x87   : > { %1112 = vmatmul.mubr.f32.vlgmr.msra.gmra.mrb[0].mxu0 %v345_v26  ;;  %v558_v26 = vcombine.high %v1664_v11, %v1664_v11 }
  0x89   : > { %v620_v0 = vrot.slane %v558_v26, %v1634_v44  ;;  %v840_v26 = vrot.slane %v753_v1, %v1634_v44 }
 0x15a   : > { %v435_v45 = vpop.f32.mrb[0].mxu0 }
 0x15b   : > { %v436_v48 = vadd.f32 %v1055_v41, %v435_v45  ;;  %v1113_v49 = vpop.f32.mrb[1].mxu0  ;;  %v560_v41 = vcombine.high %v1674_v20, %v1674_v20  ;;  %v600_v45 = vrot.slane %v549_v19, %v1634_v44  ;;  %v769_v19 = vcombine.high %v753_v1, %v753_v1 }
 0x15c   : > { %v608_v49 = vrot.slane %v559_v35, %v1634_v44 }
 0x15d   : > { %v1645_v55 = vmul.f32 0.17677669, %v436_v48  ;;  %v604_v48 = vrot.slane %v557_v22, %v1634_v44  ;;  %v624_v5 = vrot.slane %v560_v41, %v1634_v44 }
 0x15f   : > { %v447_v61 = vmul.f32 %v1056_v51, %v1645_v55  ;;  %v455_v62 = vmul.f32 %v1057_v52, %v1645_v55  ;;  %v641_v6 = vmul.f32 %v564_v57, %v1645_v55  ;;  %v642_v8 = vmul.f32 %v568_v58, %v1645_v55  ;;  %v1697_v52 = vld [vmem:[#allocation5 + $0x8] sm:$0xff] }
 0x160   : > { %v643_v9 = vmul.f32 %v572_v59, %v1645_v55  ;;  %v644_v10 = vmul.f32 %v576_v60, %v1645_v55  ;;  %v645_v15 = vmul.f32 %v580_v2, %v1645_v55  ;;  %v646_v24 = vmul.f32 %v584_v7, %v1645_v55 }
 0x161   : > { %v1655_v3 = vmax.f32 %v447_v61, %v455_v62  ;;  %v647_v27 = vmul.f32 %v588_v12, %v1645_v55  ;;  %v648_v38 = vmul.f32 %v592_v23, %v1645_v55  ;;  %v649_v50 = vmul.f32 %v596_v36, %v1645_v55 }
 0x162   : > { %v760_v51 = vrot.slane %v738_v37, %v1625_v32  ;;  %v739_v58 = vcombine.high %v737_v42, %v737_v42  ;;  %v768_v59 = vcombine.high %v746_v43, %v746_v43  ;;  %v1706_v60 = vrot.slane %v1697_v52, %v1625_v32 }
 0x163   : > { %v657_v13 = vsub.f32 %v641_v6, %v1655_v3  ;;  %v658_v16 = vsub.f32 %v642_v8, %v1655_v3  ;;  %v659_v17 = vsub.f32 %v643_v9, %v1655_v3  ;;  %v660_v18 = vsub.f32 %v644_v10, %v1655_v3 }
 0x164   : > { %v661_v25 = vsub.f32 %v645_v15, %v1655_v3  ;;  %v662_v30 = vsub.f32 %v646_v24, %v1655_v3  ;;  %v663_v39 = vsub.f32 %v647_v27, %v1655_v3  ;;  %v664_v46 = vsub.f32 %v648_v38, %v1655_v3 }
 0x165   : > { %v673_v28 = vmul.f32 1.442695, %v657_v13  ;;  %v675_v31 = vmul.f32 1.442695, %v658_v16  ;;  %v677_v33 = vmul.f32 1.442695, %v659_v17  ;;  %v665_v57 = vsub.f32 %v649_v50, %v1655_v3 }
 0x166   : > { %v679_v34 = vmul.f32 1.442695, %v660_v18  ;;  %v681_v40 = vmul.f32 1.442695, %v661_v25  ;;  %v683_v47 = vmul.f32 1.442695, %v662_v30  ;;  %v650_v61 = vmul.f32 %v600_v45, %v1645_v55 }
 0x167   : > { %1218 = vpow2.f32 %v673_v28  ;;  %v685_v56 = vmul.f32 1.442695, %v663_v39  ;;  %v687_v62 = vmul.f32 1.442695, %v664_v46  ;;  %v770_v2 = vcombine.high %v760_v51, %v760_v51 }
 0x168   : > { %1220 = vpow2.f32 %v675_v31  ;;  %v828_v4 = vrot.slane %v760_v51, %v1634_v44  ;;  %v651_v6 = vmul.f32 %v604_v48, %v1645_v55  ;;  %v666_v7 = vsub.f32 %v650_v61, %v1655_v3 }
 0x169   : > { %1222 = vpow2.f32 %v677_v33  ;;  %v689_v9 = vmul.f32 1.442695, %v665_v57  ;;  %v767_v10 = vrot.slane %v739_v58, %v1625_v32  ;;  %v787_v11 = vcombine.high %v1706_v60, %v1706_v60 }
 0x16a   : > { %1224 = vpow2.f32 %v679_v34  ;;  %v832_v12 = vrot.slane %v768_v59, %v1634_v44  ;;  %v652_v14 = vmul.f32 %v608_v49, %v1645_v55  ;;  %v667_v15 = vsub.f32 %v651_v6, %v1655_v3 }
 0x16b   : > { %1226 = vpow2.f32 %v681_v40  ;;  %v836_v20 = vrot.slane %v770_v2, %v1634_v44  ;;  %v653_v23 = vmul.f32 %v612_v53, %v1645_v55  ;;  %v691_v25 = vmul.f32 1.442695, %v666_v7 }
 0x16c   : > { %1228 = vpow2.f32 %v683_v47  ;;  %v668_v24 = vsub.f32 %v652_v14, %v1655_v3  ;;  %v654_v31 = vmul.f32 %v616_v54, %v1645_v55  ;;  %v693_v34 = vmul.f32 1.442695, %v667_v15 }
 0x16d   : > { %1230 = vpow2.f32 %v685_v56  ;;  %v669_v33 = vsub.f32 %v653_v23, %v1655_v3  ;;  %v771_v35 = vcombine.high %v767_v10, %v767_v10  ;;  %v844_v37 = vrot.slane %v767_v10, %v1634_v44 }
 0x16e   : > { %1232 = vpow2.f32 %v687_v62  ;;  %v655_v41 = vmul.f32 %v620_v0, %v1645_v55  ;;  %v670_v42 = vsub.f32 %v654_v31, %v1655_v3  ;;  %v695_v43 = vmul.f32 1.442695, %v668_v24 }
 0x16f   : > { %1234 = vpow2.f32 %v689_v9  ;;  %v848_v46 = vrot.slane %v769_v19, %v1634_v44  ;;  %v656_v50 = vmul.f32 %v624_v5, %v1645_v55  ;;  %v697_v53 = vmul.f32 1.442695, %v669_v33 }
 0x170   : > { %1236 = vpow2.f32 %v691_v25  ;;  %v671_v51 = vsub.f32 %v655_v41, %v1655_v3  ;;  %v852_v56 = vrot.slane %v771_v35, %v1634_v44  ;;  %v699_v62 = vmul.f32 1.442695, %v670_v42 }
 0x171   : > { %v1219_v8 = vpop.eup %1218  ;;  %1238 = vpow2.f32 %v693_v34  ;;  %v672_v61 = vsub.f32 %v656_v50, %v1655_v3  ;;  %v809_v3 = vrot.slane %v787_v11, %v1625_v32  ;;  %v772_v19 = vcombine.high %v1697_v52, %v1697_v52 }
 0x172   : > { %v1221_v13 = vpop.eup %1220  ;;  %v901_v16 = vmul.f32 %v1219_v8, %v824_v63  ;;  %1240 = vpow2.f32 %v695_v43  ;;  %v795_v63 = vrot.slane %v1706_v60, %v1625_v32  ;;  %v701_v2 = vmul.f32 1.442695, %v671_v51 }
 0x173   : > { %v1223_v17 = vpop.eup %1222  ;;  %v705_v18 = vadd.f32 %v1221_v13, %v1219_v8  ;;  %v902_v21 = vmul.f32 %v1221_v13, %v828_v4  ;;  %1242 = vpow2.f32 %v697_v53  ;;  %v703_v9 = vmul.f32 1.442695, %v672_v61 }
 0x174   : > { %v1225_v22 = vpop.eup %1224  ;;  %v903_v28 = vmul.f32 %v1223_v17, %v832_v12  ;;  %v856_v4 = vrot.slane %v795_v63, %v1634_v44  ;;  %1244 = vpow2.f32 %v699_v62  ;;  %v817_v14 = vcombine.high %v795_v63, %v795_v63 }
 0x175   : > { %v706_v27 = vadd.f32 %v1223_v17, %v705_v18  ;;  %v917_v29 = vadd.f32 %v902_v21, %v901_v16  ;;  %v1227_v30 = vpop.eup %1226  ;;  %v904_v38 = vmul.f32 %v1225_v22, %v836_v20  ;;  %1246 = vpow2.f32 %v701_v2 }
 0x176   : > { %v1229_v40 = vpop.eup %1228  ;;  %v905_v47 = vmul.f32 %v1227_v30, %v840_v26  ;;  %v860_v15 = vrot.slane %v809_v3, %v1634_v44  ;;  %1248 = vpow2.f32 %v703_v9  ;;  %v819_v23 = vcombine.high %v809_v3, %v809_v3 }
 0x177   : > { %v707_v36 = vadd.f32 %v1225_v22, %v706_v27  ;;  %v918_v39 = vadd.f32 %v917_v29, %v903_v28  ;;  %v1231_v49 = vpop.eup %1230  ;;  %v906_v57 = vmul.f32 %v1229_v40, %v844_v37  ;;  %v864_v60 = vrot.slane %v817_v14, %v1634_v44 }
 0x178   : > { %v1233_v59 = vpop.eup %1232  ;;  %v907_v1 = vmul.f32 %v1231_v49, %v848_v46  ;;  %v786_v26 = vrot.slane %v772_v19, %v1625_v32 }
 0x179   : > { %v708_v45 = vadd.f32 %v1227_v30, %v707_v36  ;;  %v919_v48 = vadd.f32 %v918_v39, %v904_v38  ;;  %v1235_v5 = vpop.eup %1234  ;;  %v908_v7 = vmul.f32 %v1233_v59, %v852_v56  ;;  %v868_v30 = vrot.slane %v819_v23, %v1634_v44 }
 0x17a   : > { %v1237_v13 = vpop.eup %1236  ;;  %v909_v16 = vmul.f32 %v1235_v5, %v856_v4  ;;  %v788_v52 = vcombine.high %v786_v26, %v786_v26  ;;  %v802_v35 = vrot.slane %v786_v26, %v1625_v32 }
 0x17b   : > { %v709_v54 = vadd.f32 %v1229_v40, %v708_v45  ;;  %v920_v58 = vadd.f32 %v919_v48, %v905_v47  ;;  %v1239_v18 = vpop.eup %1238  ;;  %v910_v11 = vmul.f32 %v1237_v13, %v860_v15 }
 0x17c   : > { %v1241_v22 = vpop.eup %1240  ;;  %v911_v31 = vmul.f32 %v1239_v18, %v864_v60  ;;  %v872_v39 = vrot.slane %v802_v35, %v1634_v44  ;;  %v816_v42 = vrot.slane %v788_v52, %v1625_v32  ;;  %v818_v45 = vcombine.high %v802_v35, %v802_v35 }
 0x17d   : > { %v710_v0 = vadd.f32 %v1231_v49, %v709_v54  ;;  %v921_v55 = vadd.f32 %v920_v58, %v906_v57  ;;  %v1243_v25 = vpop.eup %1242  ;;  %v912_v40 = vmul.f32 %v1241_v22, %v868_v30 }
 0x17e   : > { %v1245_v29 = vpop.eup %1244  ;;  %v876_v46 = vrot.slane %v816_v42, %v1634_v44  ;;  %v913_v47 = vmul.f32 %v1243_v25, %v872_v39  ;;  %v820_v49 = vcombine.high %v816_v42, %v816_v42  ;;  %v880_v50 = vrot.slane %v818_v45, %v1634_v44 }
 0x17f   : > { %v711_v6 = vadd.f32 %v1233_v59, %v710_v0  ;;  %v922_v8 = vadd.f32 %v921_v55, %v907_v1  ;;  %v1247_v34 = vpop.eup %1246 }
 0x180   : > { %v1249_v38 = vpop.eup %1248  ;;  %v914_v51 = vmul.f32 %v1245_v29, %v876_v46  ;;  %v884_v54 = vrot.slane %v820_v49, %v1634_v44  ;;  %v915_v56 = vmul.f32 %v1247_v34, %v880_v50 }
 0x181   : > { %v712_v10 = vadd.f32 %v1235_v5, %v711_v6  ;;  %v923_v12 = vadd.f32 %v922_v8, %v908_v7 }
 0x182   : > { %v916_v59 = vmul.f32 %v1249_v38, %v884_v54 }
 0x183   : > { %v713_v17 = vadd.f32 %v1237_v13, %v712_v10  ;;  %v924_v20 = vadd.f32 %v923_v12, %v909_v16 }
 0x185   : > { %v714_v21 = vadd.f32 %v1239_v18, %v713_v17  ;;  %v925_v27 = vadd.f32 %v924_v20, %v910_v11 }
 0x187   : > { %v715_v24 = vadd.f32 %v1241_v22, %v714_v21  ;;  %v926_v36 = vadd.f32 %v925_v27, %v911_v31 }
 0x189   : > { %v716_v28 = vadd.f32 %v1243_v25, %v715_v24  ;;  %v927_v43 = vadd.f32 %v926_v36, %v912_v40 }
 0x18b   : > { %v717_v33 = vadd.f32 %v1245_v29, %v716_v28  ;;  %v928_v48 = vadd.f32 %v927_v43, %v913_v47 }
 0x18d   : > { %v718_v37 = vadd.f32 %v1247_v34, %v717_v33  ;;  %v929_v53 = vadd.f32 %v928_v48, %v914_v51 }
 0x18f   : > { %v719_v41 = vadd.f32 %v1249_v38, %v718_v37  ;;  %v930_v32 = vadd.f32 %v929_v53, %v915_v56 }
 0x191   : > { %1250 = vrcp.f32 %v719_v41  ;;  %v931_v62 = vadd.f32 %v930_v32, %v916_v59 }
 0x19b   : > { %v1251_v57 = vpop.eup %1250 }
 0x19c   : > { %v934_v58 = vmul.f32 %v1251_v57, %v719_v41 }
 0x19e   : > { %v935_v61 = vsub.f32 2.0, %v934_v58 }
 0x1a0   : > { %v936_v63 = vmul.f32 %v1251_v57, %v935_v61 }
 0x1a2   : > { %v937_v0 = vmul.f32 %v936_v63, %v931_v62 }
 0x1a4   : > { %938 = vst [vmem:[%s340_s18] sm:$0xff] %v937_v0 }
 0x1a5   : > { %1349 = shalt.err (!%p1346_p9)
}
 0x1a6   : > { %s1350_s10 = scalar_lea.hbm %s1760_s19, 128  ;;  %s1354_s9 = scalar_lea.hbm %s1810_s8, 256 }
 0x1a7   : > { %p1351_p2 = scmp.ne.s32.totalorder %s1760_s19, %s1350_s10  ;;  %p1355_p5 = scmp.lt.u32.totalorder %s1760_s19, %s1810_s8 }
 0x1a8   : > { %p1356_p10 = scmp.lt.u32.totalorder %s1354_s9, %s1350_s10  ;;  %p1358_p4 = scmp.lt.u32.totalorder %s1350_s10, %s1760_s19 }
 0x1a9   : > { %p1352_p0 = pnand %p1351_p2, %p1830_p7 }
 0x1aa   : > { %p1357_p12 = por %p1356_p10, %p1355_p5 }
 0x1ab   : > { %p1353_p3 = pneg %p1352_p0 }
 0x1ac   : > { %p1359_p8 = por %p1358_p4, %p1357_p12 }
 0x1ae   : > { %p1360_p11 = pnand %p1359_p8, %p1353_p3 }
 0x1b0   : > { %1363 = shalt.err (!%p1360_p11)
}
 0x1b1   : > { %1150 = dma.vmem_to_hbm [thread:$0]  (%p1830_p7), %s1762_s21, 128, %s1760_s19, %s940_s23  }
 0x1b2 PF: > { %p1172_p13 = scmp.ge.s32.totalorder %s1406_s29, 2  ;;  %s965_s20 = sand.u32 1, %s1394_s3  }
 0x1b3   : > { %p1831_p1 = scmp.ne.s32.totalorder %s1821_s15, 0  ;;  %s966_s22 = scalar_lea.sflag [#allocation4], %s965_s20 }
 0x1b5   : > { %p1163_p6 = pnand %p1172_p13, %p1831_p1 }
 0x1b7   : > { %1389 = dma.done.wait (!%p1163_p6), %s966_s22, 128  }
 0x1b8   : > { %1391 = vsyncadd (!%p1163_p6), %s966_s22, 4294967168  ;;  %s1832_s29 = sld [smem:[#allocation13_spill]]  ;;  %s1833_s18 = sld [smem:[#allocation12_spill]] }
 0x1b9   : > { %s1834_s28 = sld [smem:[#allocation14_spill]]  ;;  %s1835_s3 = smov %s1398_s27 }
 0x1be   : > { %p20_p9 = scmp.ge.s32.totalorder %s1832_s29, 4   ;;  %s1836_s27 = smov %s1833_s18 }
 0x1c0   :  { %22 = sbr.rel (!%p20_p9) target bundleno = 5 (0x5), region = 100 }
 0x1c7   :  { %971 = vsyncpa [#allocation3], 1 }
 0x1c8   :  { %973 = vsyncpa [#allocation3 + $0x1], 1 }
 0x1c9   :  { %974 = vsyncpa [#allocation6], 1 }
 0x1ca   :  { %975 = vsyncpa [#allocation4], 1 }
 0x1cb   :  { %977 = vsyncpa [#allocation4 + $0x1], 1 }

</bundles_post_ra>
